<compile_context>
chip_gen: v7x
topology: tpu7x:2x2x1
jax: 0.10.0
libtpu: 0.0.40
codegen_flags: <defaults>
</compile_context>

<pallas_src>
import jax
import jax.numpy as jnp
from jax.experimental import pallas as pl
from jax.experimental.pallas import tpu as pltpu


def _round_up(x, m):
    return ((x + m - 1) // m) * m


def _pack_factor(h, lane=128):
    """Smallest divisor of `lane` that is >= h (so G = lane // Hp groups fit
    side by side in one 128-lane vreg).  For h >= lane, plain 128-padding."""
    if h >= lane:
        return _round_up(h, lane), 1
    hp = h
    while lane % hp:
        hp += 1
    return hp, lane // hp


def _mish(x):
    # mish(x) = clamp(x * tanh(softplus(x)), max=6)
    # tanh(log(1 + t)) == u / (u + 2)  with  t = e^x,  u = t * (t + 2).
    # Clamping the exp argument keeps the large-x branch finite; for x >= 20
    # u/(u+2) rounds to 1.0 in f32 so the fused form returns x, and the final
    # min() clamps it to 6, matching the reference.
    u = jnp.exp(jnp.minimum(x, 20.0))
    u = u * (u + 2.0)                       # single live [TBg, 128] f32 temp
    d = u + 2.0
    r = pl.reciprocal(d, approx=True)       # EUP slot (free next to VPU work)
    r = r * (2.0 - d * r)                   # one Newton step -> ~f32-exact
    return jnp.minimum(x * u * r, 6.0)


def softq_kernel(x_ref, w1_ref, b1_ref, w2_ref, b2_ref, w3_ref, b3_ref,
                 w4_ref, b4_ref, o_ref):
    # Layer 1: packed input [TBg, G*Din] @ block-diagonal [G*Din, 128].
    h = _mish(jnp.dot(x_ref[...].astype(jnp.bfloat16), w1_ref[...],
                      preferred_element_type=jnp.float32) + b1_ref[...])
    # Layers 2-3: block-diagonal [128, 128] weights; every lane is real data.
    h = _mish(jnp.dot(h.astype(jnp.bfloat16), w2_ref[...],
                      preferred_element_type=jnp.float32) + b2_ref[...])
    h = _mish(jnp.dot(h.astype(jnp.bfloat16), w3_ref[...],
                      preferred_element_type=jnp.float32) + b3_ref[...])
    # Final out_features=1 layer: tiny f32 MXU pass against the per-group
    # [128, G] weight, then transpose to a lane-dense [G, TBg] output block.
    q = jnp.dot(h, w4_ref[...], preferred_element_type=jnp.float32)  # [TBg, G]
    o_ref[0] = q.T + b4_ref[...]                                     # [G, TBg]


def _dim_semantics(num_tiles):
    """CORE_PARALLEL on v7-class chips (2 TCs) when there is work to split;
    plain 'arbitrary' elsewhere (parallel vs arbitrary is measured no-op)."""
    kind = ""
    try:
        kind = jax.devices()[0].device_kind.lower()
    except Exception:
        pass
    if num_tiles >= 2 and "v7" in kind:
        return (pltpu.CORE_PARALLEL,)
    return ("arbitrary",)


def softq_forward(state, action, prepared_params, *, batch_tile=512):
    """Pallas forward for SoftQNetwork.  state:[B,Ni] action:[B,Na] -> [B,1]."""
    w1bd, b1p, w2bd, b2p, w3bd, b3p, w4blk, b4m, G = prepared_params
    B, Ni = state.shape
    Na = action.shape[1]
    Din = Ni + Na
    assert w1bd.shape[0] == G * Din, "prepared params / input width mismatch"

    # torch.cat([state, action], 1) once, outside the kernel (negligible HBM).
    x = jnp.concatenate([state, action], axis=1).astype(jnp.float32)

    # Batch tile: multiple of 8*G so each lane group carries TBg = TB/G rows
    # (a multiple of the f32 sublane).  Default 512 per the perf review.
    tb_unit = 8 * G
    TB = max(tb_unit,
             (min(batch_tile, _round_up(B, tb_unit)) // tb_unit) * tb_unit)
    Bp = _round_up(B, TB)
    if Bp != B:
        x = jnp.pad(x, ((0, Bp - B), (0, 0)))
    nt, TBg = Bp // TB, TB // G

    # Lane-pack G batch sub-tiles side by side: row (i*TBg + r), lane block g
    # holds batch element i*TB + g*TBg + r.
    xp = x.reshape(nt, G, TBg, Din).transpose(0, 2, 1, 3).reshape(nt * TBg, G * Din)

    row_spec = pl.BlockSpec((TBg, G * Din), lambda i: (i, 0))
    resident = lambda a: pl.BlockSpec(a.shape, lambda i: (0,) * a.ndim)

    out = pl.pallas_call(
        softq_kernel,
        out_shape=jax.ShapeDtypeStruct((nt, G, TBg), jnp.float32),
        grid=(nt,),
        in_specs=[row_spec,
                  resident(w1bd), resident(b1p),
                  resident(w2bd), resident(b2p),
                  resident(w3bd), resident(b3p),
                  resident(w4blk), resident(b4m)],
        out_specs=pl.BlockSpec((1, G, TBg), lambda i: (i, 0, 0)),
        compiler_params=pltpu.CompilerParams(
            dimension_semantics=_dim_semantics(nt)),
    )(xp, w1bd, b1p, w2bd, b2p, w3bd, b3p, w4blk, b4m)

    # out[i, g, r] is q for batch i*TB + g*TBg + r -> row-major flatten is
    # already batch order.
    return out.reshape(Bp, 1)[:B]


def init_params(key, num_inputs, num_actions, hidden_size, init_w=0.003):
    """uniform(-init_w, init_w) init mirroring the module's __init__.
    Weights stored as [in, out] (transposed vs. PyTorch's [out, in])."""
    d_in = num_inputs + num_actions
    ks = jax.random.split(key, 8)
    u = lambda k, shape: jax.random.uniform(k, shape, jnp.float32, -init_w, init_w)
    w1 = u(ks[0], (d_in, hidden_size));        b1 = u(ks[1], (hidden_size,))
    w2 = u(ks[2], (hidden_size, hidden_size)); b2 = u(ks[3], (hidden_size,))
    w3 = u(ks[4], (hidden_size, hidden_size)); b3 = u(ks[5], (hidden_size,))
    w4 = u(ks[6], (hidden_size, 1));           b4 = u(ks[7], (1,))
    return (w1, b1, w2, b2, w3, b3, w4, b4)


def prepare_params(raw_params, num_inputs, num_actions, lane=128):
    """Pack G = 128 // Hp independent copies of the network into the 128-lane
    dimension (block-diagonal weights, per-group tiled biases) so every mish
    lane carries real data.  Zero padding within a group is exact: padded
    biases are 0 and mish(0) == 0, so padded lanes stay 0 through every layer.
    MXU operands are cast to bf16 (f32 accumulation in-kernel)."""
    w1, b1, w2, b2, w3, b3, w4, b4 = raw_params
    H = w1.shape[1]
    Din = num_inputs + num_actions
    assert w1.shape[0] == Din
    Hp, G = _pack_factor(H, lane)
    ph = Hp - H
    eye = jnp.eye(G, dtype=jnp.float32)

    bdiag = lambda w: jnp.kron(eye, w)                     # G copies on the diagonal
    w1bd = bdiag(jnp.pad(w1, ((0, 0), (0, ph)))).astype(jnp.bfloat16)   # [G*Din, L]
    w2bd = bdiag(jnp.pad(w2, ((0, ph), (0, ph)))).astype(jnp.bfloat16)  # [L, L]
    w3bd = bdiag(jnp.pad(w3, ((0, ph), (0, ph)))).astype(jnp.bfloat16)  # [L, L]
    bias = lambda b: jnp.tile(jnp.pad(b, (0, ph)), (G,))[None, :]       # [1, L] f32
    b1p, b2p, b3p = bias(b1), bias(b2), bias(b3)
    w4blk = bdiag(jnp.pad(w4, ((0, ph), (0, 0))))          # [L, G] f32 (final layer)
    b4m = b4.reshape(1, 1).astype(jnp.float32)             # [1, 1] f32
    return (w1bd, b1p, w2bd, b2p, w3bd, b3p, w4blk, b4m, G)


if __name__ == "__main__":
    num_inputs, num_actions, hidden_size = 8, 4, 32
    batch = 2

    key = jax.random.PRNGKey(0)
    k_param, k_state, k_action = jax.random.split(key, 3)

    raw = init_params(k_param, num_inputs, num_actions, hidden_size)
    params = prepare_params(raw, num_inputs, num_actions)

    state = jax.random.normal(k_state, (batch, num_inputs), jnp.float32)
    action = jax.random.normal(k_action, (batch, num_actions), jnp.float32)

    q = softq_forward(state, action, params)
    q = jax.block_until_ready(q)

    # Pure-JAX f32 reference with the module's exact math (softplus + tanh).
    def ref(state, action, raw):
        w1, b1, w2, b2, w3, b3, w4, b4 = raw
        x = jnp.concatenate([state, action], axis=1)
        m = lambda v: jnp.minimum(v * jnp.tanh(jax.nn.softplus(v)), 6.0)
        x = m(x @ w1 + b1)
        x = m(x @ w2 + b2)
        x = m(x @ w3 + b3)
        return x @ w4 + b4

    q_ref = ref(state, action, raw)
    assert q.shape == (batch, 1)
    assert jnp.allclose(q, q_ref, atol=1e-4, rtol=1e-3), (q, q_ref)

    print("KERNEL_OK")
</pallas_src>

<mosaic_0001>
module attributes {stable_mosaic.version = 11 : i64} {
  func.func @softq_kernel(%arg0: i32, %arg1: memref<8x48xf32, #tpu.memory_space<vmem>>, %arg2: memref<48x128xbf16, #tpu.memory_space<vmem>>, %arg3: memref<1x128xf32, #tpu.memory_space<vmem>>, %arg4: memref<128x128xbf16, #tpu.memory_space<vmem>>, %arg5: memref<1x128xf32, #tpu.memory_space<vmem>>, %arg6: memref<128x128xbf16, #tpu.memory_space<vmem>>, %arg7: memref<1x128xf32, #tpu.memory_space<vmem>>, %arg8: memref<128x4xf32, #tpu.memory_space<vmem>>, %arg9: memref<1x1xf32, #tpu.memory_space<vmem>>, %arg10: memref<1x4x8xf32, #tpu.memory_space<vmem>>) attributes {dimension_semantics = [#tpu.dimension_semantics<arbitrary>], iteration_bounds = array<i64: 1>, scalar_prefetch = 0 : i64, scratch_operands = 0 : i64, tpu.core_type = #tpu.core_type<tc>, window_params = [{transform_indices = @transform_0, window_bounds = array<i64: 8, 48>}, {pipeline_mode = #tpu.pipeline_mode<synchronous>, transform_indices = @transform_1, window_bounds = array<i64: 48, 128>}, {pipeline_mode = #tpu.pipeline_mode<synchronous>, transform_indices = @transform_2, window_bounds = array<i64: 1, 128>}, {pipeline_mode = #tpu.pipeline_mode<synchronous>, transform_indices = @transform_3, window_bounds = array<i64: 128, 128>}, {pipeline_mode = #tpu.pipeline_mode<synchronous>, transform_indices = @transform_4, window_bounds = array<i64: 1, 128>}, {pipeline_mode = #tpu.pipeline_mode<synchronous>, transform_indices = @transform_5, window_bounds = array<i64: 128, 128>}, {pipeline_mode = #tpu.pipeline_mode<synchronous>, transform_indices = @transform_6, window_bounds = array<i64: 1, 128>}, {pipeline_mode = #tpu.pipeline_mode<synchronous>, transform_indices = @transform_7, window_bounds = array<i64: 128, 4>}, {pipeline_mode = #tpu.pipeline_mode<synchronous>, transform_indices = @transform_8, window_bounds = array<i64: 1, 1>}, {transform_indices = @transform_9, window_bounds = array<i64: 1, 4, 8>}]} {
    %c0 = arith.constant 0 : index
    %c0_0 = arith.constant 0 : index
    %0 = vector.load %arg1[%c0, %c0_0] : memref<8x48xf32, #tpu.memory_space<vmem>>, vector<8x48xf32>
    %1 = arith.truncf %0 : vector<8x48xf32> to vector<8x48xbf16>
    %c0_1 = arith.constant 0 : index
    %c0_2 = arith.constant 0 : index
    %2 = vector.load %arg2[%c0_1, %c0_2] : memref<48x128xbf16, #tpu.memory_space<vmem>>, vector<48x128xbf16>
    %cst = arith.constant dense<0.000000e+00> : vector<8x128xf32>
    %3 = tpu.matmul %1, %2, %cst {dimension_numbers = #tpu.dot_dimension_numbers<[1], [0], [0], [1], [0, 0, 1, 1], [], []>} : vector<8x48xbf16>, vector<48x128xbf16>, vector<8x128xf32> -> vector<8x128xf32>
    %c0_3 = arith.constant 0 : index
    %c0_4 = arith.constant 0 : index
    %4 = vector.load %arg3[%c0_3, %c0_4] : memref<1x128xf32, #tpu.memory_space<vmem>>, vector<1x128xf32>
    %5 = vector.broadcast %4 : vector<1x128xf32> to vector<8x128xf32>
    %6 = arith.addf %3, %5 : vector<8x128xf32>
    %cst_5 = arith.constant 2.000000e+01 : f32
    %7 = vector.broadcast %cst_5 : f32 to vector<8x128xf32>
    %8 = arith.minimumf %6, %7 : vector<8x128xf32>
    %9 = math.exp %8 : vector<8x128xf32>
    %cst_6 = arith.constant 2.000000e+00 : f32
    %10 = vector.broadcast %cst_6 : f32 to vector<8x128xf32>
    %11 = arith.addf %9, %10 : vector<8x128xf32>
    %12 = arith.mulf %9, %11 : vector<8x128xf32>
    %cst_7 = arith.constant 2.000000e+00 : f32
    %13 = vector.broadcast %cst_7 : f32 to vector<8x128xf32>
    %14 = arith.addf %12, %13 : vector<8x128xf32>
    %15 = tpu.reciprocal %14 {approx = true} : vector<8x128xf32> -> vector<8x128xf32>
    %16 = arith.mulf %14, %15 : vector<8x128xf32>
    %cst_8 = arith.constant 2.000000e+00 : f32
    %17 = vector.broadcast %cst_8 : f32 to vector<8x128xf32>
    %18 = arith.subf %17, %16 : vector<8x128xf32>
    %19 = arith.mulf %15, %18 : vector<8x128xf32>
    %20 = arith.mulf %6, %12 : vector<8x128xf32>
    %21 = arith.mulf %20, %19 : vector<8x128xf32>
    %cst_9 = arith.constant 6.000000e+00 : f32
    %22 = vector.broadcast %cst_9 : f32 to vector<8x128xf32>
    %23 = arith.minimumf %21, %22 : vector<8x128xf32>
    %24 = arith.truncf %23 : vector<8x128xf32> to vector<8x128xbf16>
    %c0_10 = arith.constant 0 : index
    %c0_11 = arith.constant 0 : index
    %25 = vector.load %arg4[%c0_10, %c0_11] : memref<128x128xbf16, #tpu.memory_space<vmem>>, vector<128x128xbf16>
    %cst_12 = arith.constant dense<0.000000e+00> : vector<8x128xf32>
    %26 = tpu.matmul %24, %25, %cst_12 {dimension_numbers = #tpu.dot_dimension_numbers<[1], [0], [0], [1], [0, 0, 1, 1], [], []>} : vector<8x128xbf16>, vector<128x128xbf16>, vector<8x128xf32> -> vector<8x128xf32>
    %c0_13 = arith.constant 0 : index
    %c0_14 = arith.constant 0 : index
    %27 = vector.load %arg5[%c0_13, %c0_14] : memref<1x128xf32, #tpu.memory_space<vmem>>, vector<1x128xf32>
    %28 = vector.broadcast %27 : vector<1x128xf32> to vector<8x128xf32>
    %29 = arith.addf %26, %28 : vector<8x128xf32>
    %cst_15 = arith.constant 2.000000e+01 : f32
    %30 = vector.broadcast %cst_15 : f32 to vector<8x128xf32>
    %31 = arith.minimumf %29, %30 : vector<8x128xf32>
    %32 = math.exp %31 : vector<8x128xf32>
    %cst_16 = arith.constant 2.000000e+00 : f32
    %33 = vector.broadcast %cst_16 : f32 to vector<8x128xf32>
    %34 = arith.addf %32, %33 : vector<8x128xf32>
    %35 = arith.mulf %32, %34 : vector<8x128xf32>
    %cst_17 = arith.constant 2.000000e+00 : f32
    %36 = vector.broadcast %cst_17 : f32 to vector<8x128xf32>
    %37 = arith.addf %35, %36 : vector<8x128xf32>
    %38 = tpu.reciprocal %37 {approx = true} : vector<8x128xf32> -> vector<8x128xf32>
    %39 = arith.mulf %37, %38 : vector<8x128xf32>
    %cst_18 = arith.constant 2.000000e+00 : f32
    %40 = vector.broadcast %cst_18 : f32 to vector<8x128xf32>
    %41 = arith.subf %40, %39 : vector<8x128xf32>
    %42 = arith.mulf %38, %41 : vector<8x128xf32>
    %43 = arith.mulf %29, %35 : vector<8x128xf32>
    %44 = arith.mulf %43, %42 : vector<8x128xf32>
    %cst_19 = arith.constant 6.000000e+00 : f32
    %45 = vector.broadcast %cst_19 : f32 to vector<8x128xf32>
    %46 = arith.minimumf %44, %45 : vector<8x128xf32>
    %47 = arith.truncf %46 : vector<8x128xf32> to vector<8x128xbf16>
    %c0_20 = arith.constant 0 : index
    %c0_21 = arith.constant 0 : index
    %48 = vector.load %arg6[%c0_20, %c0_21] : memref<128x128xbf16, #tpu.memory_space<vmem>>, vector<128x128xbf16>
    %cst_22 = arith.constant dense<0.000000e+00> : vector<8x128xf32>
    %49 = tpu.matmul %47, %48, %cst_22 {dimension_numbers = #tpu.dot_dimension_numbers<[1], [0], [0], [1], [0, 0, 1, 1], [], []>} : vector<8x128xbf16>, vector<128x128xbf16>, vector<8x128xf32> -> vector<8x128xf32>
    %c0_23 = arith.constant 0 : index
    %c0_24 = arith.constant 0 : index
    %50 = vector.load %arg7[%c0_23, %c0_24] : memref<1x128xf32, #tpu.memory_space<vmem>>, vector<1x128xf32>
    %51 = vector.broadcast %50 : vector<1x128xf32> to vector<8x128xf32>
    %52 = arith.addf %49, %51 : vector<8x128xf32>
    %cst_25 = arith.constant 2.000000e+01 : f32
    %53 = vector.broadcast %cst_25 : f32 to vector<8x128xf32>
    %54 = arith.minimumf %52, %53 : vector<8x128xf32>
    %55 = math.exp %54 : vector<8x128xf32>
    %cst_26 = arith.constant 2.000000e+00 : f32
    %56 = vector.broadcast %cst_26 : f32 to vector<8x128xf32>
    %57 = arith.addf %55, %56 : vector<8x128xf32>
    %58 = arith.mulf %55, %57 : vector<8x128xf32>
    %cst_27 = arith.constant 2.000000e+00 : f32
    %59 = vector.broadcast %cst_27 : f32 to vector<8x128xf32>
    %60 = arith.addf %58, %59 : vector<8x128xf32>
    %61 = tpu.reciprocal %60 {approx = true} : vector<8x128xf32> -> vector<8x128xf32>
    %62 = arith.mulf %60, %61 : vector<8x128xf32>
    %cst_28 = arith.constant 2.000000e+00 : f32
    %63 = vector.broadcast %cst_28 : f32 to vector<8x128xf32>
    %64 = arith.subf %63, %62 : vector<8x128xf32>
    %65 = arith.mulf %61, %64 : vector<8x128xf32>
    %66 = arith.mulf %52, %58 : vector<8x128xf32>
    %67 = arith.mulf %66, %65 : vector<8x128xf32>
    %cst_29 = arith.constant 6.000000e+00 : f32
    %68 = vector.broadcast %cst_29 : f32 to vector<8x128xf32>
    %69 = arith.minimumf %67, %68 : vector<8x128xf32>
    %c0_30 = arith.constant 0 : index
    %c0_31 = arith.constant 0 : index
    %70 = vector.load %arg8[%c0_30, %c0_31] : memref<128x4xf32, #tpu.memory_space<vmem>>, vector<128x4xf32>
    %cst_32 = arith.constant dense<0.000000e+00> : vector<8x4xf32>
    %71 = tpu.matmul %69, %70, %cst_32 {dimension_numbers = #tpu.dot_dimension_numbers<[1], [0], [0], [1], [0, 0, 1, 1], [], []>} : vector<8x128xf32>, vector<128x4xf32>, vector<8x4xf32> -> vector<8x4xf32>
    %72 = tpu.transpose %71, [1, 0] : vector<8x4xf32> -> vector<4x8xf32>
    %c0_33 = arith.constant 0 : index
    %c0_34 = arith.constant 0 : index
    %73 = vector.load %arg9[%c0_33, %c0_34] : memref<1x1xf32, #tpu.memory_space<vmem>>, vector<1x1xf32>
    %74 = vector.broadcast %73 : vector<1x1xf32> to vector<4x8xf32>
    %75 = arith.addf %72, %74 : vector<4x8xf32>
    %c0_35 = arith.constant 0 : index
    %c0_36 = arith.constant 0 : index
    %c0_37 = arith.constant 0 : index
    %76 = vector.load %arg10[%c0_35, %c0_36, %c0_37] : memref<1x4x8xf32, #tpu.memory_space<vmem>>, vector<1x4x8xf32>
    %77 = vector.shape_cast %76 : vector<1x4x8xf32> to vector<4x8xf32>
    %78 = vector.shape_cast %75 : vector<4x8xf32> to vector<1x4x8xf32>
    tpu.vector_store %arg10[%c0_35, %c0_36, %c0_37], %78 {strides = array<i32>} : memref<1x4x8xf32, #tpu.memory_space<vmem>>, vector<1x4x8xf32>,
    return
  }
  func.func @transform_0(%arg0: i32) -> (i32, i32) {
    %c0_i32 = arith.constant 0 : i32
    %c0_i32_0 = arith.constant 0 : i32
    return %arg0, %c0_i32 : i32, i32
  }
  func.func @transform_1(%arg0: i32) -> (i32, i32) {
    %c0_i32 = arith.constant 0 : i32
    %c0_i32_0 = arith.constant 0 : i32
    %c0_i32_1 = arith.constant 0 : i32
    return %c0_i32, %c0_i32_0 : i32, i32
  }
  func.func @transform_2(%arg0: i32) -> (i32, i32) {
    %c0_i32 = arith.constant 0 : i32
    %c0_i32_0 = arith.constant 0 : i32
    %c0_i32_1 = arith.constant 0 : i32
    return %c0_i32, %c0_i32_0 : i32, i32
  }
  func.func @transform_3(%arg0: i32) -> (i32, i32) {
    %c0_i32 = arith.constant 0 : i32
    %c0_i32_0 = arith.constant 0 : i32
    %c0_i32_1 = arith.constant 0 : i32
    return %c0_i32, %c0_i32_0 : i32, i32
  }
  func.func @transform_4(%arg0: i32) -> (i32, i32) {
    %c0_i32 = arith.constant 0 : i32
    %c0_i32_0 = arith.constant 0 : i32
    %c0_i32_1 = arith.constant 0 : i32
    return %c0_i32, %c0_i32_0 : i32, i32
  }
  func.func @transform_5(%arg0: i32) -> (i32, i32) {
    %c0_i32 = arith.constant 0 : i32
    %c0_i32_0 = arith.constant 0 : i32
    %c0_i32_1 = arith.constant 0 : i32
    return %c0_i32, %c0_i32_0 : i32, i32
  }
  func.func @transform_6(%arg0: i32) -> (i32, i32) {
    %c0_i32 = arith.constant 0 : i32
    %c0_i32_0 = arith.constant 0 : i32
    %c0_i32_1 = arith.constant 0 : i32
    return %c0_i32, %c0_i32_0 : i32, i32
  }
  func.func @transform_7(%arg0: i32) -> (i32, i32) {
    %c0_i32 = arith.constant 0 : i32
    %c0_i32_0 = arith.constant 0 : i32
    %c0_i32_1 = arith.constant 0 : i32
    return %c0_i32, %c0_i32_0 : i32, i32
  }
  func.func @transform_8(%arg0: i32) -> (i32, i32) {
    %c0_i32 = arith.constant 0 : i32
    %c0_i32_0 = arith.constant 0 : i32
    %c0_i32_1 = arith.constant 0 : i32
    return %c0_i32, %c0_i32_0 : i32, i32
  }
  func.func @transform_9(%arg0: i32) -> (i32, i32, i32) {
    %c0_i32 = arith.constant 0 : i32
    %c0_i32_0 = arith.constant 0 : i32
    %c0_i32_1 = arith.constant 0 : i32
    return %arg0, %c0_i32, %c0_i32_0 : i32, i32, i32
  }
}

</mosaic_0001>

<bundles_post_ra>
// kernel: tpu_custom_call.1
= control target key start
LH: loop header
LB: loop body
LE: loop exit
PB: predicated region body
PF: predicated region fallthrough
CT: control target
= control target key end

     0   :  { %s1071_s0 = inlined_call_operand.hbm [shape: f32[8,48], index: 0, kind: input, shape index: {}]   ;;  %s1072_s1 = inlined_call_operand.hbm [shape: bf16[48,128], index: 1, kind: input, shape index: {}]   ;;  %s1073_s2 = inlined_call_operand.vmem [shape: f32[1,128], index: 2, kind: input, shape index: {}]   ;;  %s1074_s3 = inlined_call_operand.vmem [shape: bf16[128,128], index: 3, kind: input, shape index: {}]   ;;  %s1075_s4 = inlined_call_operand.vmem [shape: f32[1,128], index: 4, kind: input, shape index: {}]   ;;  %s1076_s5 = inlined_call_operand.vmem [shape: bf16[128,128], index: 5, kind: input, shape index: {}]   ;;  %s1077_s6 = inlined_call_operand.vmem [shape: f32[1,128], index: 6, kind: input, shape index: {}]   ;;  %s1078_s7 = inlined_call_operand.vmem [shape: f32[128,4], index: 7, kind: input, shape index: {}]   ;;  %s1079_s8 = inlined_call_operand.<no memory space> [shape: f32[1,1], index: 8, kind: input, shape index: {}]   ;;  %s1080_s9 = inlined_call_operand.hbm [shape: f32[1,4,8], index: 9, kind: output, shape index: {}]  }
   0x1   :  { %v14_v0 = vstv %s1079_s8 }
   0x2   :  { %15 = vst [vmem:[#allocation2] sm:$0x1] %v14_v0 }
   0x3   :  { %16 = vsyncpa [#allocation4], 0 }
   0x4   :  { %17 = vsyncpa [#allocation7], 0 }
   0x5   :  { %18 = vsyncpa [#allocation5], 0  ;;  %s834_s11 = smov [#allocation3]   ;;  %s835_s13 = smov [#allocation6]  }
   0x6   :  { %s25_s12 = sshll.u32 %s834_s11, 4  ;;  %s34_s14 = sshll.u32 %s835_s13, 4  ;;  %s26_s12 = int_to_ptr.vmem [resolvable:$true] %s25_s12  ;;  %s896_s14 = int_to_ptr.vmem [resolvable:$true] %s34_s14 }
   0x7   :  { %s762_s17 = scalar_lea.hbm %s1071_s0, 128 }
   0x8   :  { %p763_p0 = scmp.ne.s32.totalorder %s1071_s0, %s762_s17  ;;  %p766_p1 = scmp.lt.u32.totalorder %s762_s17, %s1071_s0 }
   0xa   :  { %p768_p2 = pnand %p766_p1, %p763_p0 }
   0xc   :  { %771 = shalt.err (!%p768_p2)
}
   0xd   :  { %s772_s21 = scalar_lea.vmem %s26_s12, 128  ;;  %p777_p4 = scmp.lt.s32.totalorder %s26_s12, %s26_s12 }
   0xe   :  { %p773_p3 = scmp.ne.s32.totalorder %s26_s12, %s772_s21  ;;  %p778_p5 = scmp.lt.s32.totalorder %s772_s21, %s772_s21 }
  0x10   :  { %p779_p6 = por %p778_p5, %p777_p4 }
  0x12   :  { %p780_p7 = pnand %p779_p6, %p773_p3 }
  0x14   :  { %783 = shalt.err (!%p780_p7)
}
  0x15   :  { %28 = dma.hbm_to_vmem [thread:$0]  %s1071_s0, 128, %s26_s12, [#allocation4]  }
  0x16   :  { %s784_s26 = scalar_lea.hbm %s1072_s1, 384 }
  0x17   :  { %p785_p8 = scmp.ne.s32.totalorder %s1072_s1, %s784_s26  ;;  %p788_p9 = scmp.lt.u32.totalorder %s784_s26, %s1072_s1 }
  0x19   :  { %p790_p10 = pnand %p788_p9, %p785_p8 }
  0x1b   :  { %793 = shalt.err (!%p790_p10)
}
  0x1c   :  { %s794_s10 = scalar_lea.vmem %s896_s14, 384  ;;  %p799_p12 = scmp.lt.s32.totalorder %s896_s14, %s896_s14 }
  0x1d   :  { %p795_p11 = scmp.ne.s32.totalorder %s896_s14, %s794_s10  ;;  %p800_p13 = scmp.lt.s32.totalorder %s794_s10, %s794_s10 }
  0x1f   :  { %p801_p0 = por %p800_p13, %p799_p12 }
  0x21   :  { %p802_p1 = pnand %p801_p0, %p795_p11 }
  0x23   :  { %805 = shalt.err (!%p802_p1)
}
  0x24   :  { %s836_s0 = smov 64   ;;  %s837_s11 = smov 4  }
  0x25   :  { %40 = dma.hbm_to_vmem [thread:$0]  %s1072_s1, 384, %s896_s14, [#allocation7], %s836_s0, %s836_s0, %s837_s11  }
  0x26   :  { %828 = dma.done.wait [#allocation4], 128  }
  0x27   :  { %829 = vsyncadd [#allocation4], 4294967168 }
  0x28   :  { %830 = dma.done.wait [#allocation7], 384  }
  0x29   :  { %831 = vsyncadd [#allocation7], 4294966912  ;;  %v838_v1 = vmov 0.0   ;;  %vm839_vm0 = vmmov 0   ;;  %v731_v2 = vld [vmem:[#allocation6] sm:$0xff]   ;;  %v732_v3 = vld [vmem:[#allocation6 + $0x8] sm:$0xff]  }
  0x2a   :  { %612 = vmatprep.subr.bf16.mxu0 %v838_v1  ;;  %618 = vmatprep.mubr.msk.bf16.mxu0 %vm839_vm0, %v838_v1  ;;  %vm95_vm1 = vcmask 392192   ;;  %v733_v4 = vld [vmem:[#allocation6 + $0x10] sm:$0xff]   ;;  %v62_v5 = vld [vmem:[#allocation3] sm:$0xff]  ;;  %v736_v9 = vld [vmem:[%s1074_s3 + $0x10] sm:$0xff]   ;;  %vm531_vm2 = vcmask 60416  }
  0x2b   :  { %622 = vmatprep.subr.bf16.mxu1 %v838_v1  ;;  %638 = vmatprep.mubr.msk.bf16.mxu1 %vm839_vm0, %v838_v1  ;;  %v63_v6 = vpack.c.bf16 %v62_v5, %v62_v5  ;;  %v734_v7 = vld [vmem:[%s1074_s3] sm:$0xff]   ;;  %v735_v8 = vld [vmem:[%s1074_s3 + $0x8] sm:$0xff]   ;;  %v737_v10 = vld [vmem:[%s1074_s3 + $0x18] sm:$0xff]  }
  0x2c   :  { %613 = vmatpush3.bf16.msra.mxu0 %v731_v2  ;;  %623 = vmatpush3.bf16.msra.mxu1 %v734_v7  ;;  %v738_v11 = vld [vmem:[%s1074_s3 + $0x20] sm:$0xff]   ;;  %v739_v12 = vld [vmem:[%s1074_s3 + $0x28] sm:$0xff]   ;;  %v740_v13 = vld [vmem:[%s1074_s3 + $0x30] sm:$0xff]   ;;  %v840_v2 = vmov 0.0|0.0  }
  0x2d   :  { %614 = vmatprep.subr.bf16.mxu0 %v838_v1  ;;  %624 = vmatprep.subr.bf16.mxu1 %v838_v1  ;;  %v741_v14 = vld [vmem:[%s1074_s3 + $0x38] sm:$0xff]   ;;  %v549_v15 = vld [vmem:[%s1073_s2] ss:$0 sm:$0xff]  ;;  %v743_v36 = vld [vmem:[%s1076_s5 + $0x8] sm:$0xff]  }
  0x2e   :  { %v742_v35 = vld [vmem:[%s1076_s5] sm:$0xff]   ;;  %v744_v37 = vld [vmem:[%s1076_s5 + $0x10] sm:$0xff]   ;;  %v745_v38 = vld [vmem:[%s1076_s5 + $0x18] sm:$0xff]  }
  0x2f   :  { %v746_v39 = vld [vmem:[%s1076_s5 + $0x20] sm:$0xff]   ;;  %v747_v40 = vld [vmem:[%s1076_s5 + $0x28] sm:$0xff]   ;;  %v748_v41 = vld [vmem:[%s1076_s5 + $0x30] sm:$0xff]  }
  0x30   :  { %615 = vmatpush3.bf16.msra.mxu0 %v732_v3  ;;  %625 = vmatpush3.bf16.msra.mxu1 %v735_v8  ;;  %v749_v42 = vld [vmem:[%s1076_s5 + $0x38] sm:$0xff]   ;;  %v554_v43 = vld [vmem:[%s1075_s4] ss:$0 sm:$0xff]  ;;  %v403_v0 = vld [vmem:[%s1078_s7 + $0x8] sm:$0xff] }
  0x31   :  { %616 = vmatprep.subr.bf16.mxu0 %v838_v1  ;;  %626 = vmatprep.subr.bf16.mxu1 %v838_v1  ;;  %v402_v63 = vld [vmem:[%s1078_s7] sm:$0xff]  ;;  %v404_v3 = vld [vmem:[%s1078_s7 + $0x10] sm:$0xff]  ;;  %v407_v7 = vld [vmem:[%s1078_s7 + $0x28] sm:$0xff] }
  0x34   :  { %617 = vmatpush3.bf16.msra.mxu0 %v733_v4  ;;  %627 = vmatpush3.bf16.msra.mxu1 %v736_v9  ;;  %v405_v4 = vld [vmem:[%s1078_s7 + $0x18] sm:$0xff]  ;;  %v408_v9 = vld [vmem:[%s1078_s7 + $0x30] sm:$0xff] }
  0x35   :  { %642 = vmatprep.subr.bf16.mxu0 %v838_v1  ;;  %628 = vmatprep.subr.bf16.mxu1 %v838_v1  ;;  %v701_v5 = vpack.c.bf16 %v405_v4, %v404_v3 }
  0x37   :  { %619 = vmatmul.mubr.msk.bf16.vlgmr.msra.gmra.mrb[0].mxu0 %vm95_vm1, %v63_v6  ;;  %v406_v6 = vld [vmem:[%s1078_s7 + $0x20] sm:$0xff] }
  0x38   :  { %658 = vmatprep.mubr.msk.bf16.mxu0 %vm839_vm0, %v838_v1  ;;  %629 = vmatpush3.bf16.msra.mxu1 %v737_v10  ;;  %v704_v8 = vpack.c.bf16 %v407_v7, %v406_v6  ;;  %v409_v10 = vld [vmem:[%s1078_s7 + $0x38] sm:$0xff] }
  0x39   :  { %630 = vmatprep.subr.bf16.mxu1 %v838_v1  ;;  %643 = vmatpush3.bf16.msra.mxu0 %v742_v35 }
  0x3a   :  { %644 = vmatprep.subr.bf16.mxu0 %v838_v1 }
  0x3c   :  { %631 = vmatpush3.bf16.msra.mxu1 %v738_v11  ;;  %v707_v11 = vpack.c.bf16 %v409_v10, %v408_v9 }
  0x3d   :  { %632 = vmatprep.subr.bf16.mxu1 %v838_v1  ;;  %645 = vmatpush3.bf16.msra.mxu0 %v743_v36 }
  0x3e   :  { %646 = vmatprep.subr.bf16.mxu0 %v838_v1 }
  0x40   :  { %633 = vmatpush3.bf16.msra.mxu1 %v739_v12  ;;  %v410_v12 = vld [vmem:[%s1078_s7 + $0x40] sm:$0xff] }
  0x41   :  { %634 = vmatprep.subr.bf16.mxu1 %v838_v1  ;;  %647 = vmatpush3.bf16.msra.mxu0 %v744_v37 }
  0x42   :  { %648 = vmatprep.subr.bf16.mxu0 %v838_v1 }
  0x44   :  { %635 = vmatpush3.bf16.msra.mxu1 %v740_v13  ;;  %v411_v13 = vld [vmem:[%s1078_s7 + $0x48] sm:$0xff] }
  0x45   :  { %636 = vmatprep.subr.bf16.mxu1 %v838_v1  ;;  %649 = vmatpush3.bf16.msra.mxu0 %v745_v38 }
  0x46   :  { %650 = vmatprep.subr.bf16.mxu0 %v838_v1 }
  0x48   :  { %637 = vmatpush3.bf16.msra.mxu1 %v741_v14  ;;  %v710_v14 = vpack.c.bf16 %v411_v13, %v410_v12 }
  0x49   :  { %651 = vmatpush3.bf16.msra.mxu0 %v746_v39  ;;  %697 = vmatprep.subr.bf16.mxu1 %v840_v2 }
  0x4a   :  { %652 = vmatprep.subr.bf16.mxu0 %v838_v1 }
  0x4d   :  { %653 = vmatpush3.bf16.msra.mxu0 %v747_v40 }
  0x4e   :  { %654 = vmatprep.subr.bf16.mxu0 %v838_v1 }
  0x51   :  { %655 = vmatpush3.bf16.msra.mxu0 %v748_v41 }
  0x52   :  { %656 = vmatprep.subr.bf16.mxu0 %v838_v1 }
  0x55   :  { %657 = vmatpush3.bf16.msra.mxu0 %v749_v42 }
 0x10a   :  { %v133_v16 = vpop.f32.mrb[0].mxu0 }
 0x10b   :  { %v134_v17 = vadd.f32 %v549_v15, %v133_v16  ;;  %v620_v18 = vpop.f32.mrb[1].mxu0  ;;  %v412_v15 = vld [vmem:[%s1078_s7 + $0x50] sm:$0xff]  ;;  %v413_v16 = vld [vmem:[%s1078_s7 + $0x58] sm:$0xff] }
 0x10c   :  { %v136_v19 = vpop.f32.mrb[2].mxu0  ;;  %v414_v18 = vld [vmem:[%s1078_s7 + $0x60] sm:$0xff] }
 0x10d   :  { %v139_v20 = vmin.f32 %v134_v17, 20.0  ;;  %v621_v21 = vpop.f32.mrb[3].mxu0  ;;  %v415_v19 = vld [vmem:[%s1078_s7 + $0x68] sm:$0xff] }
 0x10e   :  { %v416_v21 = vld [vmem:[%s1078_s7 + $0x70] sm:$0xff] }
 0x10f   :  { %v140_v22 = vmul.f32 1.442695, %v139_v20  ;;  %v716_v20 = vpack.c.bf16 %v415_v19, %v414_v18 }
 0x111   :  { %750 = vpow2.f32 %v140_v22  ;;  %v417_v22 = vld [vmem:[%s1078_s7 + $0x78] sm:$0xff] }
 0x11b   :  { %v751_v23 = vpop.eup %750 }
 0x11c   :  { %v142_v24 = vadd.f32 2.0, %v751_v23 }
 0x11e   :  { %v143_v25 = vmul.f32 %v751_v23, %v142_v24  ;;  %v719_v23 = vpack.c.bf16 %v417_v22, %v416_v21  ;;  %v572_v24 = vld [vmem:[#allocation2] ss:$0 sm:$0xff] }
 0x120   :  { %v144_v26 = vadd.f32 2.0, %v143_v25  ;;  %v149_v31 = vmul.f32 %v143_v25, %v134_v17  ;;  %v713_v17 = vpack.c.bf16 %v413_v16, %v412_v15  ;;  %v841_v25 = vmov 0  }
 0x121   :  { %730 = vset.pattern.permute.xlu0 %v841_v25 }
 0x122   :  { %752 = vrcp.f32 %v144_v26  ;;  %527 = vperm.xlu0 %730, %v572_v24  }
 0x12c   :  { %v753_v27 = vpop.eup %752 }
 0x12d   :  { %v146_v28 = vmul.f32 %v753_v27, %v144_v26  ;;  %v563_v26 = vld [vmem:[%s1077_s6] ss:$0 sm:$0xff]  ;;  %s842_s6 = smov [#allocation8]  }
 0x12e   :  { %s539_s7 = sshll.u32 %s842_s6, 4  ;;  %s540_s7 = int_to_ptr.vmem [resolvable:$true] %s539_s7 }
 0x12f   :  { %v147_v29 = vsub.f32 2.0, %v146_v28  ;;  %s806_s26 = scalar_lea.vmem %s540_s7, 64  ;;  %p811_p3 = scmp.lt.s32.totalorder %s540_s7, %s540_s7 }
 0x130   :  { %p807_p2 = scmp.ne.s32.totalorder %s540_s7, %s806_s26  ;;  %p812_p4 = scmp.lt.s32.totalorder %s806_s26, %s806_s26 }
 0x131   :  { %v148_v30 = vmul.f32 %v753_v27, %v147_v29 }
 0x132   :  { %p813_p5 = por %p812_p4, %p811_p3 }
 0x133   :  { %v150_v32 = vmul.f32 %v149_v31, %v148_v30 }
 0x134   :  { %p814_p6 = pnand %p813_p5, %p807_p2 }
 0x135   :  { %v151_v33 = vmin.f32 %v150_v32, 6.0 }
 0x137   :  { %v152_v34 = vpack.c.bf16 %v151_v33, %v151_v33 }
 0x139   :  { %639 = vmatmul.mubr.bf16.vlgmr.msra.gmra.mrb[0].mxu1 %v152_v34 }
 0x13a   :  { %694 = vmatprep.mubr.msk.f32.mxu1 %vm839_vm0, %v838_v1  ;;  %v698_v1 = vpack.c.bf16 %v403_v0, %v402_v63 }
 0x13c   :  { %699 = vmatpush3.bf16.msra.mxu1 %v698_v1 }
 0x13d   :  { %700 = vmatprep.subr.bf16.mxu1 %v840_v2 }
 0x140   :  { %702 = vmatpush3.bf16.msra.mxu1 %v701_v5 }
 0x141   :  { %703 = vmatprep.subr.bf16.mxu1 %v840_v2 }
 0x144   :  { %705 = vmatpush3.bf16.msra.mxu1 %v704_v8 }
 0x145   :  { %706 = vmatprep.subr.bf16.mxu1 %v840_v2 }
 0x148   :  { %708 = vmatpush3.bf16.msra.mxu1 %v707_v11 }
 0x149   :  { %709 = vmatprep.subr.bf16.mxu1 %v840_v2 }
 0x14c   :  { %711 = vmatpush3.bf16.msra.mxu1 %v710_v14 }
 0x14d   :  { %712 = vmatprep.subr.bf16.mxu1 %v840_v2 }
 0x150   :  { %714 = vmatpush3.bf16.msra.mxu1 %v713_v17 }
 0x151   :  { %715 = vmatprep.subr.bf16.mxu1 %v840_v2 }
 0x154   :  { %717 = vmatpush3.bf16.msra.mxu1 %v716_v20 }
 0x155   :  { %718 = vmatprep.subr.bf16.mxu1 %v840_v2 }
 0x158   :  { %720 = vmatpush3.bf16.msra.mxu1 %v719_v23 }
 0x20c   :  { %v258_v44 = vpop.f32.mrb[0].mxu1 }
 0x20d   :  { %v259_v45 = vadd.f32 %v554_v43, %v258_v44  ;;  %v640_v46 = vpop.f32.mrb[1].mxu1 }
 0x20e   :  { %v261_v47 = vpop.f32.mrb[2].mxu1 }
 0x20f   :  { %v264_v48 = vmin.f32 %v259_v45, 20.0  ;;  %v641_v49 = vpop.f32.mrb[3].mxu1  ;;  %v528_v47 = vpop.permute.xlu0 %527 }
 0x211   :  { %v265_v50 = vmul.f32 1.442695, %v264_v48 }
 0x213   :  { %754 = vpow2.f32 %v265_v50 }
 0x21d   :  { %v755_v51 = vpop.eup %754 }
 0x21e   :  { %v267_v52 = vadd.f32 2.0, %v755_v51 }
 0x220   :  { %v268_v53 = vmul.f32 %v755_v51, %v267_v52 }
 0x222   :  { %v269_v54 = vadd.f32 2.0, %v268_v53  ;;  %v274_v59 = vmul.f32 %v268_v53, %v259_v45 }
 0x224   :  { %756 = vrcp.f32 %v269_v54 }
 0x22e   :  { %v757_v55 = vpop.eup %756 }
 0x22f   :  { %v271_v56 = vmul.f32 %v757_v55, %v269_v54 }
 0x231   :  { %v272_v57 = vsub.f32 2.0, %v271_v56 }
 0x233   :  { %v273_v58 = vmul.f32 %v757_v55, %v272_v57 }
 0x235   :  { %v275_v60 = vmul.f32 %v274_v59, %v273_v58 }
 0x237   :  { %v276_v61 = vmin.f32 %v275_v60, 6.0 }
 0x239   :  { %v277_v62 = vpack.c.bf16 %v276_v61, %v276_v61 }
 0x23b   :  { %659 = vmatmul.mubr.bf16.vlgmr.msra.gmra.mrb[4].mxu0 %v277_v62 }
 0x30e   :  { %v383_v27 = vpop.f32.mrb[4].mxu0 }
 0x30f   :  { %v384_v28 = vadd.f32 %v563_v26, %v383_v27  ;;  %v660_v29 = vpop.f32.mrb[5].mxu0 }
 0x310   :  { %v386_v30 = vpop.f32.mrb[6].mxu0 }
 0x311   :  { %v389_v31 = vmin.f32 %v384_v28, 20.0  ;;  %v661_v32 = vpop.f32.mrb[7].mxu0 }
 0x313   :  { %v390_v33 = vmul.f32 1.442695, %v389_v31 }
 0x315   :  { %758 = vpow2.f32 %v390_v33 }
 0x31f   :  { %v759_v34 = vpop.eup %758 }
 0x320   :  { %v392_v35 = vadd.f32 2.0, %v759_v34 }
 0x322   :  { %v393_v36 = vmul.f32 %v759_v34, %v392_v35 }
 0x324   :  { %v394_v37 = vadd.f32 2.0, %v393_v36  ;;  %v399_v42 = vmul.f32 %v393_v36, %v384_v28 }
 0x326   :  { %760 = vrcp.f32 %v394_v37 }
 0x330   :  { %v761_v38 = vpop.eup %760 }
 0x331   :  { %v396_v39 = vmul.f32 %v761_v38, %v394_v37 }
 0x333   :  { %v397_v40 = vsub.f32 2.0, %v396_v39 }
 0x335   :  { %v398_v41 = vmul.f32 %v761_v38, %v397_v40 }
 0x337   :  { %v400_v43 = vmul.f32 %v399_v42, %v398_v41 }
 0x339   :  { %v401_v44 = vmin.f32 %v400_v43, 6.0 }
 0x33b   :  { %695 = vmatmul.mubr.f32.vlgmr.msra.gmra.mrb[4].mxu1 %v401_v44 }
 0x40e   :  { %v484_v45 = vpop.f32.mrb[4].mxu1 }
 0x40f   :  { %488 = vxpose.xlu0.b32.start.end [1/1] (short) (narrow) %v484_v45, 8  ;;  %v696_v46 = vpop.f32.mrb[5].mxu1 }
 0x48f   :  { %v504_v48 = vpop.trf.xlu0 }
 0x490   :  { %v530_v49 = vadd.f32 %v528_v47, %v504_v48 }
 0x492   :  { %532 = vst.msk [vmem:[#allocation8] sm:$0xf] %vm531_vm2, %v530_v49 }
 0x493   :  { %817 = shalt.err (!%p814_p6)
}
 0x494   :  { %s818_s29 = scalar_lea.hbm %s1080_s9, 64 }
 0x495   :  { %p819_p7 = scmp.ne.s32.totalorder %s1080_s9, %s818_s29  ;;  %p822_p8 = scmp.lt.u32.totalorder %s818_s29, %s1080_s9 }
 0x497   :  { %p824_p9 = pnand %p822_p8, %p819_p7 }
 0x499   :  { %827 = shalt.err (!%p824_p9)
}
 0x49a   :  { %542 = dma.vmem_to_hbm [thread:$0]  %s540_s7, 64, %s1080_s9, [#allocation5]  }
 0x49b   :  { %832 = dma.done.wait [#allocation5], 64  }
 0x49c   :  { %833 = vsyncadd [#allocation5], 4294967232 }
 0x49d   :  { %546 = vsyncpa [#allocation4], 1 }
 0x49e   :  { %547 = vsyncpa [#allocation7], 1 }
 0x49f   :  { %548 = vsyncpa [#allocation5], 1 }

</bundles_post_ra>
